<compile_context>
chip_gen: v5e
topology: v5e:2x2
jax: 0.10.0
libtpu: 0.0.40
codegen_flags: <defaults>
</compile_context>

<pallas_src>
import functools

import jax
import jax.numpy as jnp
from jax import lax
from jax.experimental import pallas as pl
from jax.experimental.pallas import tpu as pltpu


# ------------------------------- fused kernel -------------------------------

def _basic_block_kernel(p1_ref, w1_ref, b1_ref, w2_ref, b2_ref, o_ref, ypad_ref, *,
                        lout, cin, planes, proj):
    # p1  : (M, 3*Cin) bf16         im2col patches of x; batch folded into rows, M=Bt*Lout
    # w1  : (3*Cin, n1) bf16        conv1 (+ merged 1x1 shortcut) weights, BN folded
    # b1  : (1, n1)     f32
    # w2  : (3*planes, planes) bf16 conv2 taps stacked row-wise (l-1, l, l+1), BN folded
    # b2  : (1, planes) f32
    # o   : (M, planes) f32
    # ypad: (M + 32, planes) bf16 scratch holding relu(conv1) at rows [16, 16+M)
    m = o_ref.shape[0]

    # conv1 (+ projection shortcut): one MXU push over the whole batch tile,
    # bf16 operands with f32 accumulation.
    y = jnp.dot(p1_ref[...], w1_ref[...],
                preferred_element_type=jnp.float32) + b1_ref[...]
    if proj:
        y1 = jnp.maximum(y[:, :planes], 0.0)          # conv1 + bn1 + relu
        sc = y[:, planes:]                            # 1x1 shortcut conv + bn (bf16 matmul)
    else:
        y1 = jnp.maximum(y, 0.0)
        # identity shortcut == center tap of the conv1 patches (x itself, bf16-rounded).
        sc = p1_ref[:, cin:2 * cin].astype(jnp.float32)

    # conv2: store relu(conv1) once (bf16, sublane-tile aligned at offset 16) and read
    # the three shifted taps.  Rows that would cross a sequence / batch boundary
    # (including the never-written scratch rows 15 and 16+M) are replaced by zeros via
    # an iota mask, so the scratch is never zero-initialised.
    ypad_ref[pl.ds(16, m), :] = y1.astype(jnp.bfloat16)
    pos = lax.broadcasted_iota(jnp.int32, (m, planes), 0) % lout
    zero = jnp.bfloat16(0.0)
    t_prev = jnp.where(pos == 0, zero, ypad_ref[pl.ds(15, m), :])          # y1[l-1]
    t_mid = ypad_ref[pl.ds(16, m), :]                                      # y1[l]
    t_next = jnp.where(pos == lout - 1, zero, ypad_ref[pl.ds(17, m), :])   # y1[l+1]

    y2 = b2_ref[...]
    y2 = y2 + jnp.dot(t_prev, w2_ref[pl.ds(0, planes), :],
                      preferred_element_type=jnp.float32)
    y2 = y2 + jnp.dot(t_mid, w2_ref[pl.ds(planes, planes), :],
                      preferred_element_type=jnp.float32)
    y2 = y2 + jnp.dot(t_next, w2_ref[pl.ds(2 * planes, planes), :],
                      preferred_element_type=jnp.float32)

    # fused residual add + final relu, lane-dense store (channels in lanes).
    o_ref[...] = jnp.maximum(y2 + sc, 0.0)


# --------------------------------- wrapper -----------------------------------

def _batch_tile(b, lout, max_rows=2048):
    """Largest divisor of b keeping bt*lout rows per grid step under max_rows."""
    bt = b
    while bt > 1 and bt * lout > max_rows:
        bt -= 1
        while b % bt:
            bt -= 1
    return bt


def basic_block_forward(x, pk):
    """x: (B, in_planes, L) NCL (PyTorch layout). Returns (B, planes, Lout) NCL."""
    stride, planes, cin, proj = pk["stride"], pk["planes"], pk["cin"], pk["proj"]
    B, _, L = x.shape
    lout = (L + 2 - 3) // stride + 1

    # channels-last + im2col for conv1 (three strided slices; emitted directly in bf16
    # and pre-flattened so the kernel sees one big lane-dense row tile).
    # TODO(synk): for stride==1 the conv1 taps could be assembled in-kernel from x
    # itself (same scheme as conv2), dropping the 3x im2col bytes and one fused HLO.
    xt = jnp.transpose(x, (0, 2, 1))                        # (B, L, Cin)
    xp = jnp.pad(xt, ((0, 0), (1, 1), (0, 0)))              # conv1 padding=1
    cols = [xp[:, k:k + stride * (lout - 1) + 1:stride, :] for k in range(3)]
    p1 = jnp.concatenate(cols, axis=-1).astype(jnp.bfloat16)  # (B, Lout, 3*Cin)
    p1 = p1.reshape(B * lout, 3 * cin)

    bt = _batch_tile(B, lout)
    nb = B // bt
    m = bt * lout
    n1 = pk["w1"].shape[1]
    kern = functools.partial(_basic_block_kernel, lout=lout, cin=cin,
                             planes=planes, proj=proj)
    out_flat = pl.pallas_call(
        kern,
        grid=(nb,),
        in_specs=[
            pl.BlockSpec((m, 3 * cin), lambda i: (i, 0)),
            # weights / biases: constant index_map -> stay VMEM-resident across steps.
            pl.BlockSpec((3 * cin, n1), lambda i: (0, 0)),
            pl.BlockSpec((1, n1), lambda i: (0, 0)),
            pl.BlockSpec((3 * planes, planes), lambda i: (0, 0)),
            pl.BlockSpec((1, planes), lambda i: (0, 0)),
        ],
        out_specs=pl.BlockSpec((m, planes), lambda i: (i, 0)),
        out_shape=jax.ShapeDtypeStruct((B * lout, planes), jnp.float32),
        scratch_shapes=[pltpu.VMEM((m + 32, planes), jnp.bfloat16)],
        compiler_params=pltpu.CompilerParams(dimension_semantics=("parallel",)),
    )(p1, pk["w1"], pk["b1"], pk["w2"], pk["b2"])
    # TODO(synk): when stacking blocks, keep activations NLC (optionally bf16) between
    # blocks instead of converting back to NCL f32 at every block boundary.
    out = out_flat.reshape(B, lout, planes)
    return jnp.transpose(out, (0, 2, 1))                    # NCL at the module boundary


# ------------------------------ parameters ------------------------------------

def _conv_init(key, cout, cin, k):
    return jax.random.normal(key, (cout, cin, k), jnp.float32) / jnp.sqrt(float(cin * k))


def _bn_init(key, c):
    kg, kb, km, kv = jax.random.split(key, 4)
    return (1.0 + 0.1 * jax.random.normal(kg, (c,), jnp.float32),
            0.1 * jax.random.normal(kb, (c,), jnp.float32),
            0.1 * jax.random.normal(km, (c,), jnp.float32),
            1.0 + 0.1 * jax.random.uniform(kv, (c,), jnp.float32))


def _bn_fold(w, bn):
    # w: (Cout, Cin, K) torch layout -> channels-last matmul weight (K*Cin, Cout) with
    # the inference BN scale folded into the columns, plus the folded bias.
    gamma, beta, mean, var = bn
    scale = gamma / jnp.sqrt(var + 1e-5)
    cout, cin, k = w.shape
    wmat = jnp.transpose(w, (2, 1, 0)).reshape(k * cin, cout)
    return wmat * scale[None, :], beta - mean * scale


def init_basic_block(key, in_planes, planes, stride):
    ks = jax.random.split(key, 6)
    raw = {"stride": stride, "in_planes": in_planes, "planes": planes,
           "conv1": _conv_init(ks[0], planes, in_planes, 3), "bn1": _bn_init(ks[1], planes),
           "conv2": _conv_init(ks[2], planes, planes, 3), "bn2": _bn_init(ks[3], planes)}
    proj = (stride != 1) or (in_planes != planes)
    if proj:
        raw["conv_sc"] = _conv_init(ks[4], planes, in_planes, 1)
        raw["bn_sc"] = _bn_init(ks[5], planes)

    w1, b1 = _bn_fold(raw["conv1"], raw["bn1"])             # (3*Cin, P), (P,)
    w2, b2 = _bn_fold(raw["conv2"], raw["bn2"])             # (3*P, P), (P,)
    if proj:
        wsc, bsc = _bn_fold(raw["conv_sc"], raw["bn_sc"])   # (Cin, P), (P,)
        # conv1 and the 1x1 shortcut share the same input -> merge into one matmul.
        w1m = jnp.zeros((3 * in_planes, 2 * planes), jnp.float32)
        w1m = w1m.at[:, :planes].set(w1)
        w1m = w1m.at[in_planes:2 * in_planes, planes:].set(wsc)   # shortcut = center tap
        w1, b1 = w1m, jnp.concatenate([b1, bsc])

    packed = {"stride": stride, "planes": planes, "cin": in_planes, "proj": proj,
              "w1": w1.astype(jnp.bfloat16),
              "b1": b1.reshape(1, -1).astype(jnp.float32),
              "w2": w2.astype(jnp.bfloat16),                 # (3*P, P), taps row-stacked
              "b2": b2.reshape(1, planes).astype(jnp.float32)}
    return raw, packed


# ---------------------------- pure-JAX reference ------------------------------

def basic_block_ref(x, raw):
    def conv_bn(h, w, bn, stride, padding):
        y = lax.conv_general_dilated(h, w, (stride,), [(padding, padding)],
                                     dimension_numbers=("NCH", "OIH", "NCH"))
        gamma, beta, mean, var = bn
        s = gamma / jnp.sqrt(var + 1e-5)
        return y * s[None, :, None] + (beta - mean * s)[None, :, None]

    out = jnp.maximum(conv_bn(x, raw["conv1"], raw["bn1"], raw["stride"], 1), 0.0)
    out = conv_bn(out, raw["conv2"], raw["bn2"], 1, 1)
    sc = conv_bn(x, raw["conv_sc"], raw["bn_sc"], raw["stride"], 0) if "conv_sc" in raw else x
    return jnp.maximum(out + sc, 0.0)


# ----------------------------------- main --------------------------------------

if __name__ == "__main__":
    key = jax.random.PRNGKey(0)
    kp1, kp2, kx1, kx2 = jax.random.split(key, 4)
    B, L = 2, 64

    # Case 1: downsampling block (stride=2, 32 -> 64 channels, projection shortcut).
    raw1, packed1 = init_basic_block(kp1, in_planes=32, planes=64, stride=2)
    x1 = jax.random.normal(kx1, (B, 32, L), jnp.float32)
    out1 = jax.jit(lambda a: basic_block_forward(a, packed1))(x1)

    # Case 2: identity block (stride=1, 64 -> 64 channels, identity shortcut).
    raw2, packed2 = init_basic_block(kp2, in_planes=64, planes=64, stride=1)
    x2 = jax.random.normal(kx2, (B, 64, L), jnp.float32)
    out2 = jax.jit(lambda a: basic_block_forward(a, packed2))(x2)

    jax.block_until_ready((out1, out2))

    ref1 = basic_block_ref(x1, raw1)
    ref2 = basic_block_ref(x2, raw2)
    assert out1.shape == (B, 64, L // 2), out1.shape
    assert out2.shape == (B, 64, L), out2.shape
    assert bool(jnp.all(jnp.isfinite(out1))) and bool(jnp.all(jnp.isfinite(out2)))
    # bf16 matmul operands (and bf16-rounded residual path) with f32 accumulation ->
    # loose tolerance vs. the f32 reference.
    err1 = float(jnp.max(jnp.abs(out1 - ref1)))
    err2 = float(jnp.max(jnp.abs(out2 - ref2)))
    assert err1 < 0.15, err1
    assert err2 < 0.15, err2
    print("KERNEL_OK")
</pallas_src>

<mosaic_0001>
module attributes {stable_mosaic.version = 11 : i64} {
  func.func @_basic_block_kernel(%arg0: i32, %arg1: memref<64x96xbf16, #tpu.memory_space<vmem>>, %arg2: memref<96x128xbf16, #tpu.memory_space<vmem>>, %arg3: memref<1x128xf32, #tpu.memory_space<vmem>>, %arg4: memref<192x64xbf16, #tpu.memory_space<vmem>>, %arg5: memref<1x64xf32, #tpu.memory_space<vmem>>, %arg6: memref<64x64xf32, #tpu.memory_space<vmem>>, %arg7: memref<96x64xbf16, #tpu.memory_space<vmem>>) attributes {dimension_semantics = [#tpu.dimension_semantics<parallel>], iteration_bounds = array<i64: 1>, scalar_prefetch = 0 : i64, scratch_operands = 1 : i64, tpu.core_type = #tpu.core_type<tc>, window_params = [{transform_indices = @transform_0, window_bounds = array<i64: 64, 96>}, {pipeline_mode = #tpu.pipeline_mode<synchronous>, transform_indices = @transform_1, window_bounds = array<i64: 96, 128>}, {pipeline_mode = #tpu.pipeline_mode<synchronous>, transform_indices = @transform_2, window_bounds = array<i64: 1, 128>}, {pipeline_mode = #tpu.pipeline_mode<synchronous>, transform_indices = @transform_3, window_bounds = array<i64: 192, 64>}, {pipeline_mode = #tpu.pipeline_mode<synchronous>, transform_indices = @transform_4, window_bounds = array<i64: 1, 64>}, {transform_indices = @transform_5, window_bounds = array<i64: 64, 64>}]} {
    %c0 = arith.constant 0 : index
    %c0_0 = arith.constant 0 : index
    %0 = vector.load %arg1[%c0, %c0_0] : memref<64x96xbf16, #tpu.memory_space<vmem>>, vector<64x96xbf16>
    %c0_1 = arith.constant 0 : index
    %c0_2 = arith.constant 0 : index
    %1 = vector.load %arg2[%c0_1, %c0_2] : memref<96x128xbf16, #tpu.memory_space<vmem>>, vector<96x128xbf16>
    %cst = arith.constant dense<0.000000e+00> : vector<64x128xf32>
    %2 = tpu.matmul %0, %1, %cst {dimension_numbers = #tpu.dot_dimension_numbers<[1], [0], [0], [1], [0, 0, 1, 1], [], []>} : vector<64x96xbf16>, vector<96x128xbf16>, vector<64x128xf32> -> vector<64x128xf32>
    %c0_3 = arith.constant 0 : index
    %c0_4 = arith.constant 0 : index
    %3 = vector.load %arg3[%c0_3, %c0_4] : memref<1x128xf32, #tpu.memory_space<vmem>>, vector<1x128xf32>
    %4 = vector.broadcast %3 : vector<1x128xf32> to vector<64x128xf32>
    %5 = arith.addf %2, %4 : vector<64x128xf32>
    %6 = vector.extract_strided_slice %5 {offsets = [0, 0], sizes = [64, 64], strides = [1, 1]} : vector<64x128xf32> to vector<64x64xf32>
    %cst_5 = arith.constant 0.000000e+00 : f32
    %7 = vector.broadcast %cst_5 : f32 to vector<64x64xf32>
    %8 = arith.maximumf %6, %7 : vector<64x64xf32>
    %9 = vector.extract_strided_slice %5 {offsets = [0, 64], sizes = [64, 64], strides = [1, 1]} : vector<64x128xf32> to vector<64x64xf32>
    %10 = arith.truncf %8 : vector<64x64xf32> to vector<64x64xbf16>
    %c16 = arith.constant 16 : index
    %c0_6 = arith.constant 0 : index
    %11 = vector.load %arg7[%c16, %c0_6] : memref<96x64xbf16, #tpu.memory_space<vmem>>, vector<64x64xbf16>
    tpu.vector_store %arg7[%c16, %c0_6], %10 {strides = array<i32>} : memref<96x64xbf16, #tpu.memory_space<vmem>>, vector<64x64xbf16>,
    %12 = tpu.iota {dimensions = array<i32: 0>} : vector<64x64xi32>
    %c32_i32 = arith.constant 32 : i32
    %c0_i32 = arith.constant 0 : i32
    %13 = arith.cmpi eq, %c32_i32, %c0_i32 : i32
    %c1_i32 = arith.constant 1 : i32
    %14 = arith.select %13, %c1_i32, %c32_i32 : i32
    %15 = vector.broadcast %14 : i32 to vector<64x64xi32>
    %16 = arith.remsi %12, %15 : vector<64x64xi32>
    %c0_i32_7 = arith.constant 0 : i32
    %17 = vector.broadcast %c0_i32_7 : i32 to vector<64x64xi32>
    %18 = arith.cmpi ne, %16, %17 : vector<64x64xi32>
    %c0_i32_8 = arith.constant 0 : i32
    %19 = vector.broadcast %c0_i32_8 : i32 to vector<64x64xi32>
    %20 = arith.cmpi slt, %16, %19 : vector<64x64xi32>
    %c0_i32_9 = arith.constant 0 : i32
    %21 = arith.cmpi slt, %14, %c0_i32_9 : i32
    %22 = vector.broadcast %21 : i1 to vector<64x64xi1>
    %23 = vector.broadcast %22 : vector<64x64xi1> to vector<64x64xi1>
    %24 = arith.xori %20, %23 : vector<64x64xi1>
    %25 = arith.andi %24, %18 : vector<64x64xi1>
    %26 = vector.broadcast %14 : i32 to vector<64x64xi32>
    %27 = arith.addi %16, %26 : vector<64x64xi32>
    %28 = arith.select %25, %27, %16 : vector<64x64xi1>, vector<64x64xi32>
    %c0_i32_10 = arith.constant 0 : i32
    %29 = vector.broadcast %c0_i32_10 : i32 to vector<64x64xi32>
    %30 = arith.cmpi eq, %28, %29 : vector<64x64xi32>
    %c15 = arith.constant 15 : index
    %c0_11 = arith.constant 0 : index
    %31 = vector.load %arg7[%c15, %c0_11] : memref<96x64xbf16, #tpu.memory_space<vmem>>, vector<64x64xbf16>
    %cst_12 = arith.constant 0.000000e+00 : bf16
    %32 = vector.broadcast %cst_12 : bf16 to vector<64x64xbf16>
    %33 = arith.select %30, %32, %31 : vector<64x64xi1>, vector<64x64xbf16>
    %c16_13 = arith.constant 16 : index
    %c0_14 = arith.constant 0 : index
    %34 = vector.load %arg7[%c16_13, %c0_14] : memref<96x64xbf16, #tpu.memory_space<vmem>>, vector<64x64xbf16>
    %c31_i32 = arith.constant 31 : i32
    %35 = vector.broadcast %c31_i32 : i32 to vector<64x64xi32>
    %36 = arith.cmpi eq, %28, %35 : vector<64x64xi32>
    %c17 = arith.constant 17 : index
    %c0_15 = arith.constant 0 : index
    %37 = vector.load %arg7[%c17, %c0_15] : memref<96x64xbf16, #tpu.memory_space<vmem>>, vector<64x64xbf16>
    %cst_16 = arith.constant 0.000000e+00 : bf16
    %38 = vector.broadcast %cst_16 : bf16 to vector<64x64xbf16>
    %39 = arith.select %36, %38, %37 : vector<64x64xi1>, vector<64x64xbf16>
    %c0_17 = arith.constant 0 : index
    %c0_18 = arith.constant 0 : index
    %40 = vector.load %arg5[%c0_17, %c0_18] : memref<1x64xf32, #tpu.memory_space<vmem>>, vector<1x64xf32>
    %c0_19 = arith.constant 0 : index
    %c0_20 = arith.constant 0 : index
    %41 = vector.load %arg4[%c0_19, %c0_20] : memref<192x64xbf16, #tpu.memory_space<vmem>>, vector<64x64xbf16>
    %cst_21 = arith.constant dense<0.000000e+00> : vector<64x64xf32>
    %42 = tpu.matmul %33, %41, %cst_21 {dimension_numbers = #tpu.dot_dimension_numbers<[1], [0], [0], [1], [0, 0, 1, 1], [], []>} : vector<64x64xbf16>, vector<64x64xbf16>, vector<64x64xf32> -> vector<64x64xf32>
    %43 = vector.broadcast %40 : vector<1x64xf32> to vector<64x64xf32>
    %44 = arith.addf %43, %42 : vector<64x64xf32>
    %c64 = arith.constant 64 : index
    %c0_22 = arith.constant 0 : index
    %45 = vector.load %arg4[%c64, %c0_22] : memref<192x64xbf16, #tpu.memory_space<vmem>>, vector<64x64xbf16>
    %cst_23 = arith.constant dense<0.000000e+00> : vector<64x64xf32>
    %46 = tpu.matmul %34, %45, %cst_23 {dimension_numbers = #tpu.dot_dimension_numbers<[1], [0], [0], [1], [0, 0, 1, 1], [], []>} : vector<64x64xbf16>, vector<64x64xbf16>, vector<64x64xf32> -> vector<64x64xf32>
    %47 = arith.addf %44, %46 : vector<64x64xf32>
    %c128 = arith.constant 128 : index
    %c0_24 = arith.constant 0 : index
    %48 = vector.load %arg4[%c128, %c0_24] : memref<192x64xbf16, #tpu.memory_space<vmem>>, vector<64x64xbf16>
    %cst_25 = arith.constant dense<0.000000e+00> : vector<64x64xf32>
    %49 = tpu.matmul %39, %48, %cst_25 {dimension_numbers = #tpu.dot_dimension_numbers<[1], [0], [0], [1], [0, 0, 1, 1], [], []>} : vector<64x64xbf16>, vector<64x64xbf16>, vector<64x64xf32> -> vector<64x64xf32>
    %50 = arith.addf %47, %49 : vector<64x64xf32>
    %51 = arith.addf %50, %9 : vector<64x64xf32>
    %cst_26 = arith.constant 0.000000e+00 : f32
    %52 = vector.broadcast %cst_26 : f32 to vector<64x64xf32>
    %53 = arith.maximumf %51, %52 : vector<64x64xf32>
    %c0_27 = arith.constant 0 : index
    %c0_28 = arith.constant 0 : index
    %54 = vector.load %arg6[%c0_27, %c0_28] : memref<64x64xf32, #tpu.memory_space<vmem>>, vector<64x64xf32>
    tpu.vector_store %arg6[%c0_27, %c0_28], %53 {strides = array<i32>} : memref<64x64xf32, #tpu.memory_space<vmem>>, vector<64x64xf32>,
    return
  }
  func.func @transform_0(%arg0: i32) -> (i32, i32) {
    %c0_i32 = arith.constant 0 : i32
    %c0_i32_0 = arith.constant 0 : i32
    return %arg0, %c0_i32 : i32, i32
  }
  func.func @transform_1(%arg0: i32) -> (i32, i32) {
    %c0_i32 = arith.constant 0 : i32
    %c0_i32_0 = arith.constant 0 : i32
    %c0_i32_1 = arith.constant 0 : i32
    return %c0_i32, %c0_i32_0 : i32, i32
  }
  func.func @transform_2(%arg0: i32) -> (i32, i32) {
    %c0_i32 = arith.constant 0 : i32
    %c0_i32_0 = arith.constant 0 : i32
    %c0_i32_1 = arith.constant 0 : i32
    return %c0_i32, %c0_i32_0 : i32, i32
  }
  func.func @transform_3(%arg0: i32) -> (i32, i32) {
    %c0_i32 = arith.constant 0 : i32
    %c0_i32_0 = arith.constant 0 : i32
    %c0_i32_1 = arith.constant 0 : i32
    return %c0_i32, %c0_i32_0 : i32, i32
  }
  func.func @transform_4(%arg0: i32) -> (i32, i32) {
    %c0_i32 = arith.constant 0 : i32
    %c0_i32_0 = arith.constant 0 : i32
    %c0_i32_1 = arith.constant 0 : i32
    return %c0_i32, %c0_i32_0 : i32, i32
  }
  func.func @transform_5(%arg0: i32) -> (i32, i32) {
    %c0_i32 = arith.constant 0 : i32
    %c0_i32_0 = arith.constant 0 : i32
    return %arg0, %c0_i32 : i32, i32
  }
}

</mosaic_0001>

<bundles_post_ra>
// kernel: _lambda_.1
= control target key start
LH: loop header
LB: loop body
LE: loop exit
PB: predicated region body
PF: predicated region fallthrough
CT: control target
= control target key end

     0   :  { %s1735_s0 = inlined_call_operand.vmem [shape: bf16[64,96], index: 0, kind: input, shape index: {}]   ;;  %s1736_s1 = inlined_call_operand.vmem [shape: bf16[96,128], index: 1, kind: input, shape index: {}]   ;;  %s1737_s2 = inlined_call_operand.vmem [shape: f32[1,128], index: 2, kind: input, shape index: {}]   ;;  %s1738_s3 = inlined_call_operand.vmem [shape: bf16[192,64], index: 3, kind: input, shape index: {}]   ;;  %s1739_s4 = inlined_call_operand.vmem [shape: f32[1,64], index: 4, kind: input, shape index: {}]   ;;  %s1740_s5 = inlined_call_operand.hbm [shape: f32[64,64], index: 5, kind: output, shape index: {}]  }
   0x1   :  { %v1233_v0 = vld [vmem:[%s1736_s1 + $0x28] sm:$0xff]  ;;  %v1232_v1 = vld [vmem:[%s1736_s1 + $0x20] sm:$0xff] }
   0x2   :  { %119 = vmatpush.bf16.msra.mxu0 %v1233_v0 }
   0x3   :  { %10 = vsyncpa [#allocation4], 0  ;;  %v1231_v2 = vld [vmem:[%s1736_s1 + $0x18] sm:$0xff]  ;;  %v1230_v3 = vld [vmem:[%s1736_s1 + $0x10] sm:$0xff]  ;;  %vm104_vm0 = vcmask 785408   ;;  %v171_v10 = vlaneseq  ;;  %v1284_v17 = vmov 0  }
   0x4   :  { %v1229_v4 = vld [vmem:[%s1736_s1 + $0x8] sm:$0xff]  ;;  %v1228_v5 = vld [vmem:[%s1736_s1] sm:$0xff]  ;;  %v1226_v8 = vld [vmem:[%s1735_s0 + $0x10] sm:$0xff]  ;;  %vm1285_vm3 = vmmov 0   ;;  %vm309_vm5 = vsmask.f32 3328  ;;  %v1420_v53 = vunpack.c.l.b16 %v1284_v17  ;;  %v1425_v56 = vunpack.c.h.b16 %v1284_v17 }
   0x5   :  { %v1224_v6 = vld [vmem:[%s1735_s0] sm:$0xff]  ;;  %v1225_v7 = vld [vmem:[%s1735_s0 + $0x8] sm:$0xff]  ;;  %v1227_v9 = vld [vmem:[%s1735_s0 + $0x18] sm:$0xff]  ;;  %v1350_v11 = vshrl.u32 %v171_v10, 7  ;;  %vm310_vm6 = vsmask.f32 7440 }
   0x6   :  { %120 = vmatpush.bf16.msra.mxu0 %v1232_v1  ;;  %v1245_v12 = vld [vmem:[%s1738_s3 + $0x38] sm:$0xff]  ;;  %v1244_v14 = vld [vmem:[%s1738_s3 + $0x30] sm:$0xff]  ;;  %v1243_v15 = vld [vmem:[%s1738_s3 + $0x28] sm:$0xff]  ;;  %s1286_s28 = smov 64   ;;  %vm162_vm7 = vcmask 519168   ;;  %s1092_s15 = sshll.u32 %s1740_s5, 4  ;;  %s1093_s15 = int_to_ptr.hbm [resolvable:$true] %s1092_s15 }
   0x7   :  { %856 = vmatpush.bf16.msra.mxu2 %v1245_v12  ;;  %v184_v13 = vand.u32 31, %v1350_v11  ;;  %v1242_v16 = vld [vmem:[%s1738_s3 + $0x20] sm:$0xff]  ;;  %vm294_vm4 = vmpackc.low %vm1285_vm3, %vm1285_vm3  ;;  %v1241_v21 = vld [vmem:[%s1738_s3 + $0x18] sm:$0xff]  ;;  %v175_v25 = vadd.s32 24, %v1350_v11  ;;  %v176_v39 = vadd.s32 32, %v1350_v11  ;;  %s1288_s16 = smov 128  }
   0x8   :  { %752 = vmatpush.bf16.msra.mxu1 %v1241_v21  ;;  %v302_v24 = vsel %vm294_vm4, 65537, %v1284_v17  ;;  %v1376_v26 = vld [vmem:[%s1737_s2] ss:$0 sm:$0xff]  ;;  %v1240_v27 = vld [vmem:[%s1738_s3 + $0x10] sm:$0xff]  ;;  %v1249_v31 = vld [vmem:[%s1738_s3 + $0x58] sm:$0xff]  ;;  %s1289_s17 = smov 8  }
   0x9   :  { %vm276_vm1 = vcmp.eq.s32.totalorder %v184_v13, 0  ;;  %v322_v29 = vshll.u32 %v302_v24, 16  ;;  %v205_v32 = vand.u32 31, %v175_v25  ;;  %997 = vmatpush.bf16.msra.mxu3 %v1249_v31  ;;  %v1239_v34 = vld [vmem:[%s1738_s3 + $0x8] sm:$0xff]  ;;  %v326_v35 = vshrl.u32 %v302_v24, 16  ;;  %v1248_v40 = vld [vmem:[%s1738_s3 + $0x50] sm:$0xff]  ;;  %vm1396_vm8 = vmor %vm309_vm5, %vm310_vm6 }
   0xa   :  { %121 = vmatpush.bf16.msra.mxu0 %v1231_v2  ;;  %vm293_vm2 = vmpackc.low %vm276_vm1, %vm276_vm1  ;;  %v1238_v45 = vld [vmem:[%s1738_s3] sm:$0xff]  ;;  %vm488_vm10 = vsmask.f32 256  ;;  %vm489_vm12 = vsmask.f32 4368  ;;  %v212_v48 = vand.u32 31, %v176_v39 }
   0xb   :  { %857 = vmatpush.bf16.msra.mxu2 %v1244_v14  ;;  %v301_v18 = vsel %vm293_vm2, 65537, %v1284_v17  ;;  %v1390_v38 = vrot.slane %v322_v29, 5  ;;  %v328_v42 = vrot.slane %v326_v35, 4  ;;  %vm1400_vm9 = vcmp.eq.s32.totalorder %v205_v32, 31  ;;  %v1247_v50 = vld [vmem:[%s1738_s3 + $0x48] sm:$0xff]  ;;  %vm1437_vm13 = vmor %vm488_vm10, %vm489_vm12 }
   0xc   :  { %v313_v19 = vshll.u32 %v301_v18, 16  ;;  %v316_v20 = vshrl.u32 %v301_v18, 16  ;;  %753 = vmatpush.bf16.msra.mxu1 %v1240_v27  ;;  %vm475_vm11 = vmpackc.low %vm1400_vm9, %vm1400_vm9  ;;  %v494_v47 = vrot.slane %v326_v35, 7  ;;  %vm1444_vm14 = vcmp.eq.s32.totalorder %v212_v48, 0  ;;  %v284_v12 = vld [vmem:[#allocation2 + $0x4] sm:$0x8] }
   0xd   :  { %998 = vmatpush.bf16.msra.mxu3 %v1248_v40  ;;  %v329_v51 = vor.u32 %v328_v42, %v1390_v38  ;;  %v483_v60 = vsel %vm475_vm11, 65537, %v1284_v17  ;;  %vm297_vm3 = vmpackc.low %vm1444_vm14, %vm1444_vm14  ;;  %vm735_vm9 = vcmask 523264  }
   0xe   :  { %122 = vmatpush.bf16.msra.mxu0 %v1230_v3  ;;  %v1369_v22 = vrot.slane %v313_v19, 5  ;;  %v318_v23 = vrot.slane %v316_v20, 4  ;;  %v1427_v57 = vrot.slane %v494_v47, 4  ;;  %v1442_v63 = vor.u32 %v494_v47, %v322_v29  ;;  %v1246_v3 = vld [vmem:[%s1738_s3 + $0x40] sm:$0xff] }
   0xf   :  { %858 = vmatpush.bf16.msra.mxu2 %v1243_v15  ;;  %v1448_v1 = vrot.slane %v329_v51, 4  ;;  %v521_v20 = vshll.u32 %v483_v60, 16  ;;  %v305_v21 = vsel %vm297_vm3, 65537, %v1284_v17  ;;  %v179_v51 = vadd.s32 56, %v1350_v11 }
  0x10   :  { %v319_v28 = vor.u32 %v318_v23, %v1369_v22  ;;  %754 = vmatpush.bf16.msra.mxu1 %v1239_v34  ;;  %v391_v52 = vunpack.c.l.b16 %v1369_v22  ;;  %v392_v55 = vunpack.c.h.b16 %v1369_v22  ;;  %v562_v22 = vunpack.c.l.b16 %v1442_v63 }
  0x11   :  { %999 = vmatpush.bf16.msra.mxu3 %v1247_v50  ;;  %v335_v13 = vsel %vm1396_vm8, %v1448_v1, %v1390_v38  ;;  %v563_v23 = vunpack.c.h.b16 %v1442_v63  ;;  %v356_v24 = vshrl.u32 %v305_v21, 16  ;;  %v352_v32 = vshll.u32 %v305_v21, 16 }
  0x12   :  { %123 = vmatpush.bf16.msra.mxu0 %v1229_v4  ;;  %v320_v37 = vrot.slane %v319_v28, 4  ;;  %vm1451_vm15 = vcmp.ne.s32.totalorder %v391_v52, %v1420_v53  ;;  %v405_v27 = vunpack.c.l.b16 %v335_v13  ;;  %v406_v28 = vunpack.c.h.b16 %v335_v13 }
  0x13   :  { %859 = vmatpush.bf16.msra.mxu2 %v1242_v16  ;;  %vm1513_vm11 = vcmp.ne.s32.totalorder %v562_v22, %v1420_v53  ;;  %vm1518_vm12 = vcmp.ne.s32.totalorder %v563_v23, %v1425_v56  ;;  %v358_v39 = vrot.slane %v356_v24, 4 }
  0x14   :  { %v325_v46 = vsel %vm1396_vm8, %v320_v37, %v1390_v38  ;;  %755 = vmatpush.bf16.msra.mxu1 %v1238_v45  ;;  %vm409_vm14 = vcmp.ne.s32.totalorder %v405_v27, %v1420_v53 }
  0x15   :  { %v398_v58 = vunpack.c.l.b16 %v325_v46  ;;  %v399_v59 = vunpack.c.h.b16 %v325_v46  ;;  %1000 = vmatpush.bf16.msra.mxu3 %v1246_v3  ;;  %v354_v46 = vrot.slane %v352_v32, 5 }
  0x16   :  { %124 = vmatpush.bf16.msra.mxu0 %v1228_v5  ;;  %v233_v5 = vand.u32 31, %v179_v51 }
  0x17   :  { %vm1468_vm1 = vcmp.ne.s32.totalorder %v398_v58, %v1420_v53  ;;  %vm1473_vm2 = vcmp.ne.s32.totalorder %v399_v59, %v1425_v56  ;;  %v359_v50 = vor.u32 %v358_v39, %v354_v46  ;;  %v355_v59 = vsel %vm1396_vm8, %v1448_v1, %v354_v46 }
  0x18   :  { %vm404_vm5 = vmpackc.low %vm1473_vm2, %vm1468_vm1 }
  0x19   :  { %1144 = vmatmul.msk.bf16.vlgmr.msra.gmra.mxu0 %vm104_vm0, %v1224_v6  ;;  %v506_v6 = vsel %vm1437_vm13, %v1427_v57, %v1442_v63  ;;  %vm568_vm1 = vmpackc.low %vm1518_vm12, %vm1513_vm11  ;;  %vm666_vm12 = vsmask.f32 4352 }
  0x1a   :  { %v569_v14 = vunpack.c.l.b16 %v506_v6  ;;  %v570_v15 = vunpack.c.h.b16 %v506_v6 }
  0x1c   :  { %vm1506_vm6 = vcmp.ne.s32.totalorder %v569_v14, %v1420_v53  ;;  %vm574_vm10 = vcmp.ne.s32.totalorder %v570_v15, %v1425_v56  ;;  %v419_v14 = vunpack.c.l.b16 %v355_v59 }
  0x29   :  { %1145 = vmatmul.msk.bf16.gmra.mxu0 %vm104_vm0, %v1225_v7  ;;  %v518_v7 = vshrl.u32 %v483_v60, 16 }
  0x2b   :  { %v1494_v19 = vrot.slane %v518_v7, 7 }
  0x2d   :  { %v523_v34 = vor.u32 %v521_v20, %v1494_v19  ;;  %v420_v20 = vunpack.c.h.b16 %v355_v59 }
  0x2f   :  { %v524_v48 = vsel %vm1437_vm13, %v1427_v57, %v523_v34  ;;  %vm1591_vm11 = vcmp.ne.s32.totalorder %v420_v20, %v1425_v56 }
  0x30   :  { %v583_v58 = vunpack.c.l.b16 %v524_v48  ;;  %v584_v0 = vunpack.c.h.b16 %v524_v48 }
  0x32   :  { %vm1558_vm3 = vcmp.ne.s32.totalorder %v583_v58, %v1420_v53 }
  0x39   :  { %1146 = vmatmul.msk.bf16.gmra.mxu0 %vm104_vm0, %v1226_v8 }
  0x49   :  { %1147 = vmatmul.msk.bf16.gmra.mxu0 %vm104_vm0, %v1227_v9  ;;  %vm1459_vm0 = vcmp.ne.s32.totalorder %v392_v55, %v1425_v56 }
  0x4a   :  { %vm397_vm4 = vmpackc.low %vm1459_vm0, %vm1451_vm15  ;;  %vm410_vm15 = vcmp.ne.s32.totalorder %v406_v28, %v1425_v56 }
  0x4b   :  { %v454_v29 = vsel %vm397_vm4, 0, %v284_v12  ;;  %vm1528_vm0 = vmpackc.low %vm574_vm10, %vm1506_vm6  ;;  %vm1563_vm4 = vcmp.ne.s32.totalorder %v584_v0, %v1425_v56 }
  0x4c   :  { %v652_v40 = vunpack.c.l.b16 %v454_v29  ;;  %vm1540_vm2 = vmpackc.low %vm410_vm15, %vm409_vm14  ;;  %v525_v29 = vrot.slane %v1494_v19, 4 }
  0x4d   :  { %vm589_vm6 = vmpackc.low %vm1563_vm4, %vm1558_vm3  ;;  %vm920_vm4 = vsmask.f32 7424 }
  0x96   :  { %v126_v30 = vpop.f32.mrf.mxu0 }
  0x97   :  { %v127_v33 = vadd.f32 %v1376_v26, %v126_v30 }
  0x99   :  { %v146_v36 = vmax.f32 %v127_v33, 0.0  ;;  %1038 = vrot.lane.b32.xlu0 %v127_v33, %s1286_s28 }
  0x9b   :  { %v154_v44 = vpack.c.bf16 %v146_v36, %v146_v36 }
  0x9d   :  { %163 = vst.msk [vmem:[#allocation2 + $0x8] sm:$0xf] %vm162_vm7, %v154_v44 }
  0x9e   :  { %v128_v49 = vpop.f32.mrf.mxu0 }
  0x9f   :  { %v129_v54 = vadd.f32 %v1376_v26, %v128_v49 }
  0xa1   :  { %v147_v62 = vmax.f32 %v129_v54, 0.0  ;;  %1040 = vrot.lane.b32.xlu0 %v129_v54, %s1286_s28 }
  0xa3   :  { %v155_v4 = vpack.c.bf16 %v147_v62, %v147_v62 }
  0xa4   :  { %v285_v18 = vld [vmem:[#allocation2 + $0x8] sm:$0xf] }
  0xa5   :  { %164 = vst.msk [vmem:[#allocation2 + $0xc] sm:$0xf] %vm162_vm7, %v155_v4  ;;  %v455_v30 = vsel %vm404_vm5, 0, %v285_v18  ;;  %v625_v2 = vsel %vm568_vm1, 0, %v285_v18  ;;  %v360_v4 = vrot.slane %v359_v50, 4  ;;  %vm1570_vm5 = vcmp.eq.s32.totalorder %v233_v5, 31 }
  0xa6   :  { %v131_v10 = vpop.f32.mrf.mxu0  ;;  %v653_v42 = vunpack.c.l.b16 %v455_v30  ;;  %v906_v13 = vunpack.c.l.b16 %v625_v2  ;;  %vm479_vm10 = vmpackc.low %vm1570_vm5, %vm1570_vm5 }
  0xa7   :  { %v132_v16 = vadd.f32 %v1376_v26, %v131_v10  ;;  %v365_v23 = vsel %vm1396_vm8, %v360_v4, %v1390_v38  ;;  %vm1581_vm8 = vcmp.ne.s32.totalorder %v419_v14, %v1420_v53  ;;  %v487_v51 = vsel %vm479_vm10, 65537, %v1284_v17 }
  0xa8   :  { %v661_v54 = vpack.c.b16 %v653_v42, %v652_v40  ;;  %v427_v34 = vunpack.c.h.b16 %v365_v23  ;;  %vm425_vm1 = vmpackc.low %vm1591_vm11, %vm1581_vm8  ;;  %v554_v0 = vshrl.u32 %v487_v51, 16  ;;  %v557_v18 = vshll.u32 %v487_v51, 16 }
  0xa9   :  { %v148_v25 = vmax.f32 %v132_v16, 0.0  ;;  %1042 = vrot.lane.b32.xlu1 %v132_v16, %s1286_s28 }
  0xaa   :  { %v668_v7 = vshrl.u32 %v661_v54, 16  ;;  %v671_v8 = vshll.u32 %v661_v54, 16  ;;  %vm1618_vm15 = vcmp.ne.s32.totalorder %v427_v34, %v1425_v56 }
  0xab   :  { %v156_v33 = vpack.c.bf16 %v148_v25, %v148_v25 }
  0xac   :  { %v1234_v35 = vld [vmem:[#allocation2 + $0x8] sm:$0xff]  ;;  %v670_v27 = vrot.slane %v668_v7, 3  ;;  %v673_v28 = vrot.slane %v671_v8, 4 }
  0xad   :  { %165 = vst.msk [vmem:[#allocation2 + $0x10] sm:$0xf] %vm162_vm7, %v156_v33  ;;  %1200 = vmatmul.msk.bf16.vlgmr.msra.gmra.mxu2 %vm735_vm9, %v1234_v35  ;;  %v286_v44 = vld [vmem:[#allocation2 + $0xc] sm:$0xf]  ;;  %v426_v33 = vunpack.c.l.b16 %v365_v23 }
  0xae   :  { %v133_v43 = vpop.f32.mrf.mxu0  ;;  %v626_v55 = vsel %vm1528_vm0, 0, %v286_v44  ;;  %v456_v62 = vsel %vm1540_vm2, 0, %v286_v44  ;;  %v674_v42 = vor.u32 %v673_v28, %v670_v27  ;;  %v533_v44 = vsel %vm1437_vm13, %v525_v29, %v1442_v63 }
  0xaf   :  { %v134_v47 = vadd.f32 %v1376_v26, %v133_v43  ;;  %v907_v11 = vunpack.c.l.b16 %v626_v55  ;;  %v654_v10 = vunpack.c.l.b16 %v456_v62  ;;  %vm1613_vm14 = vcmp.ne.s32.totalorder %v426_v33, %v1420_v53 }
  0xb0   :  { %v591_v62 = vunpack.c.h.b16 %v533_v44  ;;  %vm432_vm3 = vmpackc.low %vm1618_vm15, %vm1613_vm14 }
  0xb1   :  { %v149_v52 = vmax.f32 %v134_v47, 0.0  ;;  %1044 = vrot.lane.b32.xlu1 %v134_v47, %s1286_s28  ;;  %v915_v22 = vpack.c.b16 %v907_v11, %v906_v13 }
  0xb3   :  { %v157_v60 = vpack.c.bf16 %v149_v52, %v149_v52  ;;  %v924_v39 = vshll.u32 %v915_v22, 16  ;;  %v922_v2 = vshrl.u32 %v915_v22, 16 }
  0xb4   :  { %v287_v3 = vld [vmem:[#allocation2 + $0x10] sm:$0xf] }
  0xb5   :  { %166 = vst.msk [vmem:[#allocation2 + $0x14] sm:$0xf] %vm162_vm7, %v157_v60  ;;  %v457_v6 = vsel %vm1540_vm2, 0, %v287_v3  ;;  %v627_v32 = vsel %vm1528_vm0, 0, %v287_v3  ;;  %v926_v59 = vrot.slane %v924_v39, 1  ;;  %v590_v60 = vunpack.c.l.b16 %v533_v44 }
  0xb6   :  { %v136_v9 = vpop.f32.mrf.mxu0  ;;  %v655_v12 = vunpack.c.l.b16 %v457_v6  ;;  %v908_v48 = vunpack.c.l.b16 %v627_v32 }
  0xb7   :  { %v137_v15 = vadd.f32 %v1376_v26, %v136_v9  ;;  %v927_v5 = vor.u32 %v926_v59, %v922_v2  ;;  %vm1638_vm5 = vcmp.ne.s32.totalorder %v590_v60, %v1420_v53 }
  0xb8   :  { %v662_v21 = vpack.c.b16 %v655_v12, %v654_v10  ;;  %v556_v12 = vrot.slane %v554_v0, 7 }
  0xb9   :  { %v150_v25 = vmax.f32 %v137_v15, 0.0  ;;  %1046 = vrot.lane.b32.xlu2 %v137_v15, %s1286_s28 }
  0xba   :  { %v676_v30 = vshrl.u32 %v662_v21, 16  ;;  %v679_v31 = vshll.u32 %v662_v21, 16  ;;  %v561_v63 = vrot.slane %v556_v12, 4 }
  0xbb   :  { %v158_v41 = vpack.c.bf16 %v150_v25, %v150_v25  ;;  %v559_v25 = vor.u32 %v557_v18, %v556_v12 }
  0xbc   :  { %v1235_v19 = vld [vmem:[#allocation2 + $0x10] sm:$0xff]  ;;  %v678_v35 = vrot.slane %v676_v30, 3  ;;  %v681_v36 = vrot.slane %v679_v31, 4  ;;  %v618_v60 = vunpack.c.l.b16 %v561_v63 }
  0xbd   :  { %v288_v37 = vld [vmem:[#allocation2 + $0x14] sm:$0xf]  ;;  %167 = vst.msk [vmem:[#allocation2 + $0x18] sm:$0xf] %vm162_vm7, %v158_v41  ;;  %1201 = vmatmul.msk.bf16.gmra.mxu2 %vm735_vm9, %v1235_v19 }
  0xbe   :  { %v628_v43 = vsel %vm589_vm6, 0, %v288_v37  ;;  %v138_v46 = vpop.f32.mrf.mxu0  ;;  %v682_v47 = vor.u32 %v681_v36, %v678_v35  ;;  %v458_v4 = vsel %vm425_vm1, 0, %v288_v37  ;;  %vm1643_vm6 = vcmp.ne.s32.totalorder %v591_v62, %v1425_v56 }
  0xbf   :  { %v909_v50 = vunpack.c.l.b16 %v628_v43  ;;  %v139_v52 = vadd.f32 %v1376_v26, %v138_v46  ;;  %v656_v15 = vunpack.c.l.b16 %v458_v4  ;;  %vm596_vm8 = vmpackc.low %vm1643_vm6, %vm1638_vm5  ;;  %v560_v35 = vsel %vm1437_vm13, %v1427_v57, %v559_v25 }
  0xc0   :  { %v683_v55 = vsel %vm666_vm12, %v674_v42, %v682_v47  ;;  %v611_v42 = vunpack.c.l.b16 %v560_v35  ;;  %v612_v46 = vunpack.c.h.b16 %v560_v35  ;;  %v447_v57 = vunpack.c.l.b16 %v1448_v1 }
  0xc1   :  { %v1623_v58 = vpack.c.b16 %v909_v50, %v908_v48  ;;  %v151_v17 = vmax.f32 %v139_v52, 0.0  ;;  %1048 = vrot.lane.b32.xlu2 %v139_v52, %s1286_s28  ;;  %1164 = vmatmul.msk.bf16.vlgmr.msra.gmra.mxu1 %vm735_vm9, %v683_v55  ;;  %v619_v62 = vunpack.c.h.b16 %v561_v63  ;;  %vm622_vm15 = vcmp.ne.s32.totalorder %v618_v60, %v1420_v53 }
  0xc2   :  { %vm1675_vm13 = vcmp.ne.s32.totalorder %v611_v42, %v1420_v53  ;;  %vm1681_vm10 = vcmp.ne.s32.totalorder %v612_v46, %v1425_v56 }
  0xc3   :  { %v929_v3 = vshll.u32 %v1623_v58, 16  ;;  %v159_v11 = vpack.c.bf16 %v151_v17, %v151_v17  ;;  %v933_v43 = vshrl.u32 %v1623_v58, 16  ;;  %vm617_vm11 = vmpackc.low %vm1681_vm10, %vm1675_vm13  ;;  %vm623_vm1 = vcmp.ne.s32.totalorder %v619_v62, %v1425_v56 }
  0xc4   :  { %v289_v7 = vld [vmem:[#allocation2 + $0x18] sm:$0xf] }
  0xc5   :  { %v931_v6 = vrot.slane %v929_v3, 1  ;;  %168 = vst.msk [vmem:[#allocation2 + $0x1c] sm:$0xf] %vm162_vm7, %v159_v11  ;;  %v459_v8 = vsel %vm432_vm3, 0, %v289_v7  ;;  %v629_v28 = vsel %vm596_vm8, 0, %v289_v7 }
  0xc6   :  { %v141_v13 = vpop.f32.mrf.mxu0  ;;  %v657_v16 = vunpack.c.l.b16 %v459_v8  ;;  %v910_v34 = vunpack.c.l.b16 %v629_v28 }
  0xc7   :  { %v932_v14 = vsel %vm920_vm4, %v927_v5, %v931_v6  ;;  %v142_v20 = vadd.f32 %v1376_v26, %v141_v13 }
  0xc8   :  { %1220 = vmatmul.msk.bf16.vlgmr.msra.gmra.mxu3 %vm735_vm9, %v932_v14  ;;  %v663_v21 = vpack.c.b16 %v657_v16, %v656_v15  ;;  %v471_v16 = vld [vmem:[#allocation2 + $0x28] sm:$0x1] }
  0xc9   :  { %v152_v22 = vmax.f32 %v142_v20, 0.0  ;;  %1050 = vrot.lane.b32.xlu0 %v142_v20, %s1286_s28 }
  0xca   :  { %v685_v23 = vshrl.u32 %v663_v21, 16  ;;  %v688_v24 = vshll.u32 %v663_v21, 16 }
  0xcb   :  { %v160_v27 = vpack.c.bf16 %v152_v22, %v152_v22 }
  0xcc   :  { %v1236_v29 = vld [vmem:[#allocation2 + $0x18] sm:$0xff]  ;;  %v687_v30 = vrot.slane %v685_v23, 3  ;;  %v690_v31 = vrot.slane %v688_v24, 4 }
  0xcd   :  { %v290_v38 = vld [vmem:[#allocation2 + $0x1c] sm:$0xf]  ;;  %169 = vst.msk [vmem:[#allocation2 + $0x20] sm:$0xf] %vm162_vm7, %v160_v27  ;;  %1202 = vmatmul.msk.bf16.gmra.mxu2 %vm735_vm9, %v1236_v29 }
  0xce   :  { %v630_v41 = vsel %vm1528_vm0, 0, %v290_v38  ;;  %v143_v32 = vpop.f32.mrf.mxu0  ;;  %v691_v33 = vor.u32 %v690_v31, %v687_v30  ;;  %v460_v61 = vsel %vm1540_vm2, 0, %v290_v38 }
  0xcf   :  { %v911_v19 = vunpack.c.l.b16 %v630_v41  ;;  %v144_v36 = vadd.f32 %v1376_v26, %v143_v32  ;;  %v448_v26 = vunpack.c.h.b16 %v1448_v1  ;;  %v658_v58 = vunpack.c.l.b16 %v460_v61 }
  0xd0   :  { %v692_v37 = vsel %vm666_vm12, %v682_v47, %v691_v33  ;;  %v935_v47 = vor.u32 %v933_v43, %v931_v6 }
  0xd1   :  { %v917_v39 = vpack.c.b16 %v911_v19, %v910_v34  ;;  %v153_v40 = vmax.f32 %v144_v36, 0.0  ;;  %1052 = vrot.lane.b32.xlu1 %v144_v36, %s1286_s28  ;;  %1165 = vmatmul.msk.bf16.gmra.mxu1 %vm735_vm9, %v692_v37  ;;  %v1714_v36 = vld [vmem:[%s1739_s4] ss:$0 sm:$0xff]  ;;  %s1287_s4 = smov [#allocation3]  }
  0xd2   :  { %s1090_s1 = sshll.u32 %s1287_s4, 4  ;;  %s1091_s1 = int_to_ptr.vmem [resolvable:$true] %s1090_s1 }
  0xd3   :  { %v937_v44 = vshll.u32 %v917_v39, 16  ;;  %v161_v48 = vpack.c.bf16 %v153_v40, %v153_v40  ;;  %v941_v18 = vshrl.u32 %v917_v39, 16 }
  0xd4   :  { %v291_v51 = vld [vmem:[#allocation2 + $0x20] sm:$0xf] }
  0xd5   :  { %v939_v50 = vrot.slane %v937_v44, 1  ;;  %170 = vst.msk [vmem:[#allocation2 + $0x24] sm:$0xf] %vm162_vm7, %v161_v48  ;;  %v461_v52 = vsel %vm1540_vm2, 0, %v291_v51  ;;  %vm1687_vm7 = vcmp.ne.s32.totalorder %v447_v57, %v1420_v53  ;;  %vm452_vm2 = vcmp.ne.s32.totalorder %v448_v26, %v1425_v56 }
  0xd6   :  { %v659_v59 = vunpack.c.l.b16 %v461_v52  ;;  %vm453_vm14 = vmpackc.low %vm452_vm2, %vm1687_vm7  ;;  %v631_v3 = vsel %vm1528_vm0, 0, %v291_v51 }
  0xd7   :  { %v940_v55 = vsel %vm920_vm4, %v935_v47, %v939_v50  ;;  %v912_v10 = vunpack.c.l.b16 %v631_v3  ;;  %vm624_vm0 = vmpackc.low %vm623_vm1, %vm622_vm15  ;;  %v943_v53 = vor.u32 %v941_v18, %v939_v50 }
  0xd8   :  { %1221 = vmatmul.msk.bf16.gmra.mxu3 %vm735_vm9, %v940_v55  ;;  %v664_v17 = vpack.c.b16 %v659_v59, %v658_v58  ;;  %v633_v21 = vsel %vm624_vm0, 0, %v471_v16 }
  0xd9   :  { %v914_v25 = vunpack.c.l.b16 %v633_v21 }
  0xda   :  { %v694_v0 = vshrl.u32 %v664_v17, 16  ;;  %v697_v2 = vshll.u32 %v664_v17, 16 }
  0xdb   :  { %v919_v29 = vpack.c.b16 %v914_v25, %v914_v25 }
  0xdc   :  { %v1237_v11 = vld [vmem:[#allocation2 + $0x20] sm:$0xff]  ;;  %v696_v4 = vrot.slane %v694_v0, 3  ;;  %v699_v5 = vrot.slane %v697_v2, 4 }
  0xdd   :  { %v292_v6 = vld [vmem:[#allocation2 + $0x24] sm:$0xf]  ;;  %1203 = vmatmul.msk.bf16.gmra.mxu2 %vm735_vm9, %v1237_v11  ;;  %v953_v31 = vshll.u32 %v919_v29, 16 }
  0xde   :  { %v632_v7 = vsel %vm617_vm11, 0, %v292_v6  ;;  %v462_v8 = vsel %vm453_vm14, 0, %v292_v6  ;;  %v700_v9 = vor.u32 %v699_v5, %v696_v4 }
  0xdf   :  { %v913_v12 = vunpack.c.l.b16 %v632_v7  ;;  %v660_v13 = vunpack.c.l.b16 %v462_v8 }
  0xe0   :  { %v701_v14 = vsel %vm666_vm12, %v691_v33, %v700_v9  ;;  %v955_v33 = vrot.slane %v953_v31, 1 }
  0xe1   :  { %v918_v45 = vpack.c.b16 %v913_v12, %v912_v10  ;;  %v665_v15 = vpack.c.b16 %v660_v13, %v660_v13  ;;  %1166 = vmatmul.msk.bf16.gmra.mxu1 %vm735_vm9, %v701_v14 }
  0xe3   :  { %v945_v20 = vshll.u32 %v918_v45, 16  ;;  %v703_v56 = vshrl.u32 %v665_v15, 16  ;;  %v706_v23 = vshll.u32 %v665_v15, 16  ;;  %v949_v41 = vshrl.u32 %v918_v45, 16 }
  0xe5   :  { %v947_v22 = vrot.slane %v945_v20, 1  ;;  %v705_v27 = vrot.slane %v703_v56, 3  ;;  %v708_v28 = vrot.slane %v706_v23, 4 }
  0xe7   :  { %v948_v24 = vsel %vm920_vm4, %v943_v53, %v947_v22  ;;  %v709_v30 = vor.u32 %v708_v28, %v705_v27  ;;  %v951_v32 = vor.u32 %v949_v41, %v947_v22 }
  0xe8   :  { %1222 = vmatmul.msk.bf16.gmra.mxu3 %vm735_vm9, %v948_v24 }
  0xe9   :  { %v710_v38 = vsel %vm666_vm12, %v700_v9, %v709_v30  ;;  %v956_v34 = vsel %vm920_vm4, %v951_v32, %v955_v33 }
  0xf1   :  { %1167 = vmatmul.msk.bf16.gmra.mxu1 %vm735_vm9, %v710_v38 }
  0xf8   :  { %1223 = vmatmul.msk.bf16.gmra.mxu3 %vm735_vm9, %v956_v34 }
 0x10b   :  { %v1039_v43 = vpop.permute.xlu0 %1038 }
 0x113   :  { %v1041_v54 = vpop.permute.xlu0 %1040  ;;  %v1047_v45 = vpop.permute.xlu2 %1046 }
 0x11b   :  { %v1043_v17 = vpop.permute.xlu1 %1042  ;;  %v1049_v25 = vpop.permute.xlu2 %1048 }
 0x123   :  { %v1045_v8 = vpop.permute.xlu1 %1044 }
 0x130   :  { %v861_v19 = vpop.f32.mrf.mxu2 }
 0x138   :  { %v863_v37 = vpop.f32.mrf.mxu2 }
 0x13b   :  { %v1051_v33 = vpop.permute.xlu0 %1050 }
 0x13e   :  { %v757_v35 = vpop.f32.mrf.mxu1 }
 0x13f   :  { %v780_v39 = vadd.f32 %v1714_v36, %v757_v35 }
 0x140   :  { %v866_v57 = vpop.f32.mrf.mxu2 }
 0x141   :  { %v881_v42 = vadd.f32 %v861_v19, %v780_v39 }
 0x146   :  { %v759_v40 = vpop.f32.mrf.mxu1 }
 0x147   :  { %v781_v48 = vadd.f32 %v1714_v36, %v759_v40 }
 0x148   :  { %v868_v1 = vpop.f32.mrf.mxu2 }
 0x149   :  { %v882_v50 = vadd.f32 %v863_v37, %v781_v48 }
 0x14b   :  { %v1002_v44 = vpop.f32.mrf.mxu3 }
 0x14c   :  { %v1022_v46 = vadd.f32 %v1002_v44, %v881_v42 }
 0x14e   :  { %v1062_v61 = vadd.f32 %v1039_v43, %v1022_v46  ;;  %v762_v26 = vpop.f32.mrf.mxu1  ;;  %v1053_v43 = vpop.permute.xlu1 %1052 }
 0x14f   :  { %v782_v63 = vadd.f32 %v1714_v36, %v762_v26 }
 0x150   :  { %v1070_v47 = vmax.f32 %v1062_v61, 0.0  ;;  %v871_v5 = vpop.f32.mrf.mxu2 }
 0x151   :  { %v883_v49 = vadd.f32 %v866_v57, %v782_v63 }
 0x152   :  { %1078 = vst.msk [vmem:[#allocation3] sm:$0xff] %vm735_vm9, %v1070_v47 }
 0x153   :  { %v1004_v51 = vpop.f32.mrf.mxu3 }
 0x154   :  { %v1023_v52 = vadd.f32 %v1004_v51, %v882_v50 }
 0x156   :  { %v1063_v55 = vadd.f32 %v1041_v54, %v1023_v52  ;;  %v764_v58 = vpop.f32.mrf.mxu1 }
 0x157   :  { %v783_v0 = vadd.f32 %v1714_v36, %v764_v58 }
 0x158   :  { %v1071_v59 = vmax.f32 %v1063_v55, 0.0  ;;  %v873_v18 = vpop.f32.mrf.mxu2 }
 0x159   :  { %v884_v4 = vadd.f32 %v868_v1, %v783_v0 }
 0x15a   :  { %1079 = vst.msk [vmem:[#allocation3 + $0x8] sm:$0xff] %vm735_vm9, %v1071_v59 }
 0x15b   :  { %v1007_v60 = vpop.f32.mrf.mxu3 }
 0x15c   :  { %v1024_v62 = vadd.f32 %v1007_v60, %v883_v49 }
 0x15e   :  { %v1064_v2 = vadd.f32 %v1043_v17, %v1024_v62  ;;  %v767_v3 = vpop.f32.mrf.mxu1 }
 0x15f   :  { %v784_v9 = vadd.f32 %v1714_v36, %v767_v3 }
 0x160   :  { %v1072_v11 = vmax.f32 %v1064_v2, 0.0  ;;  %v876_v29 = vpop.f32.mrf.mxu2 }
 0x161   :  { %v885_v14 = vadd.f32 %v871_v5, %v784_v9 }
 0x162   :  { %1080 = vst.msk [vmem:[#allocation3 + $0x10] sm:$0xff] %vm735_vm9, %v1072_v11 }
 0x163   :  { %v1009_v6 = vpop.f32.mrf.mxu3 }
 0x164   :  { %v1025_v7 = vadd.f32 %v1009_v6, %v884_v4 }
 0x166   :  { %v1065_v10 = vadd.f32 %v1045_v8, %v1025_v7  ;;  %v769_v12 = vpop.f32.mrf.mxu1 }
 0x167   :  { %v785_v20 = vadd.f32 %v1714_v36, %v769_v12 }
 0x168   :  { %v1073_v13 = vmax.f32 %v1065_v10, 0.0  ;;  %v878_v37 = vpop.f32.mrf.mxu2 }
 0x169   :  { %v886_v56 = vadd.f32 %v873_v18, %v785_v20 }
 0x16a   :  { %1081 = vst.msk [vmem:[#allocation3 + $0x18] sm:$0xff] %vm735_vm9, %v1073_v13 }
 0x16b   :  { %v1012_v15 = vpop.f32.mrf.mxu3 }
 0x16c   :  { %v1026_v16 = vadd.f32 %v1012_v15, %v885_v14 }
 0x16e   :  { %v1066_v21 = vadd.f32 %v1047_v45, %v1026_v16  ;;  %v772_v22 = vpop.f32.mrf.mxu1 }
 0x16f   :  { %v786_v27 = vadd.f32 %v1714_v36, %v772_v22 }
 0x170   :  { %v1074_v53 = vmax.f32 %v1066_v21, 0.0 }
 0x171   :  { %v887_v31 = vadd.f32 %v876_v29, %v786_v27 }
 0x172   :  { %1082 = vst.msk [vmem:[#allocation3 + $0x20] sm:$0xff] %vm735_vm9, %v1074_v53 }
 0x173   :  { %v1014_v23 = vpop.f32.mrf.mxu3 }
 0x174   :  { %v1027_v24 = vadd.f32 %v1014_v23, %v886_v56 }
 0x176   :  { %v1067_v28 = vadd.f32 %v1049_v25, %v1027_v24  ;;  %v774_v38 = vpop.f32.mrf.mxu1 }
 0x177   :  { %v787_v34 = vadd.f32 %v1714_v36, %v774_v38 }
 0x178   :  { %v1075_v30 = vmax.f32 %v1067_v28, 0.0 }
 0x179   :  { %v888_v39 = vadd.f32 %v878_v37, %v787_v34 }
 0x17a   :  { %1083 = vst.msk [vmem:[#allocation3 + $0x28] sm:$0xff] %vm735_vm9, %v1075_v30 }
 0x17b   :  { %v1017_v41 = vpop.f32.mrf.mxu3 }
 0x17c   :  { %v1028_v32 = vadd.f32 %v1017_v41, %v887_v31 }
 0x17e   :  { %v1068_v19 = vadd.f32 %v1051_v33, %v1028_v32 }
 0x180   :  { %v1076_v35 = vmax.f32 %v1068_v19, 0.0 }
 0x182   :  { %1084 = vst.msk [vmem:[#allocation3 + $0x30] sm:$0xff] %vm735_vm9, %v1076_v35 }
 0x183   :  { %v1019_v40 = vpop.f32.mrf.mxu3 }
 0x184   :  { %v1029_v42 = vadd.f32 %v1019_v40, %v888_v39 }
 0x186   :  { %v1069_v44 = vadd.f32 %v1053_v43, %v1029_v42 }
 0x188   :  { %v1077_v46 = vmax.f32 %v1069_v44, 0.0 }
 0x18a   :  { %1085 = vst.msk [vmem:[#allocation3 + $0x38] sm:$0xff] %vm735_vm9, %v1077_v46 }
 0x18b   :  { %1098 = dma.vmem_to_hbm [thread:$0]  %s1091_s1, 1024, %s1093_s15, [#allocation4], %s1288_s16, %s1288_s16, %s1289_s17  }
 0x18c   :  { %1282 = dma.done.wait [#allocation4], 1024  }
 0x18d   :  { %1283 = vsyncadd [#allocation4], 4294966272 }
 0x18e   :  { %1103 = vsyncpa [#allocation4], 1 }

</bundles_post_ra>
